<compile_context>
chip_gen: v6e
topology: v6e:2x2x1
jax: 0.10.0
libtpu: 0.0.40
codegen_flags: <defaults>
</compile_context>

<pallas_src>
import functools
from math import log2

import jax
import jax.numpy as jnp
from jax.experimental import pallas as pl
from jax.experimental.pallas import tpu as pltpu

LRELU_SLOPE = 0.2
_F32 = jnp.float32
_BF16 = jnp.bfloat16


# ----------------------------------------------------------------------------- helpers
def _nbytes(shape, dtype):
    n = 1
    for s in shape:
        n *= int(s)
    return n * jnp.dtype(dtype).itemsize


@functools.lru_cache(maxsize=None)
def _vmem_ceiling():
    # Generation-aware VMEM budget: ~3/4 of physical capacity (48 MiB on v7x's 64 MiB,
    # ~96 MiB on v5e/v6e's 128 MiB).  Falls back to the conservative v7x number.
    cap = 64 << 20
    try:
        cap = int(pltpu.get_tpu_info().vmem_capacity_bytes)
    except Exception:
        pass
    return max(int(cap * 3 // 4), 32 << 20)


def _cparams(est_bytes):
    # est_bytes counts each block/scratch once; double for double-buffering + headroom.
    limit = int(min(max(2 * est_bytes + (4 << 20), 32 << 20), _vmem_ceiling()))
    return pltpu.CompilerParams(dimension_semantics=("parallel",),
                                vmem_limit_bytes=limit)


def _col_pool_matrix(w):
    # (w//2, w) with 0.25 at [p, 2p] and [p, 2p+1].  Applied to the VPU-summed row pair,
    # this yields the exact 2x2 average == F.interpolate(scale=0.5, bilinear, no corners).
    q = jnp.arange(w)
    p = jnp.arange(w // 2)
    hit = (q[None, :] // 2) == p[:, None]
    return jnp.where(hit, 0.25, 0.0).astype(_F32)


def _pick_strip(h, w, cout, cap=16384, even=False):
    # Rows per accumulator strip; keeps the f32 accumulator around <=16 vregs.
    s = h
    while s > 1 and s * w * cout > cap:
        s //= 2
    if even and s < 2:
        s = 2
    assert h % s == 0
    return s


def _avgpool2x2_host(x):
    # Exact bilinear 0.5x of the raw 3-channel image (tiny op, host XLA).
    n, h, w, c = x.shape
    return x.reshape(n, h // 2, 2, w // 2, 2, c).mean(axis=(2, 4))


# ----------------------------------------------------------------------------- fused stage kernel
def _stage_kernel(*refs, h, w, cin, cmid, strip1, strip2, lerp):
    """One discriminator stage, fully fused:
         conv3x3(pad1)+LReLU -> conv3x3(pad1)+LReLU -> 2x2 avg pool [-> fade-in lerp]

    refs: x (1,h,w,cin) bf16/f32, w1 (3,3*cin,cmid) bf16, b1 (1,cmid) f32,
          w2 (3,3*cmid,cmid) bf16, b2 (1,cmid) f32, pcol (w/2,w) f32,
          [half (1,p_out,cmid) f32, alpha (1,) f32 SMEM],
          o (1,p_out,cmid), scratch xpad1 (h+2,w+2,cin) f32, xpad2 (h+2,w+2,cmid) f32,
          opool (p_out,cmid) f32.
    kx taps are pre-packed into the K dim of w1/w2 (K = 3*cin / 3*cmid).
    """
    x_ref, w1_ref, b1_ref, w2_ref, b2_ref, pcol_ref = refs[:6]
    k = 6
    half_ref = alpha_ref = None
    if lerp:
        half_ref, alpha_ref = refs[k], refs[k + 1]
        k += 2
    o_ref, xpad1_ref, xpad2_ref, opool_ref = refs[k], refs[k + 1], refs[k + 2], refs[k + 3]

    # ---- halo scratch 1: zero only the 1-px border, copy interior (single bf16->f32 cast)
    xpad1_ref[0:1] = jnp.zeros((1, w + 2, cin), _F32)
    xpad1_ref[h + 1:h + 2] = jnp.zeros((1, w + 2, cin), _F32)
    xpad1_ref[1:h + 1, 0:1, :] = jnp.zeros((h, 1, cin), _F32)
    xpad1_ref[1:h + 1, w + 1:w + 2, :] = jnp.zeros((h, 1, cin), _F32)
    xpad1_ref[1:h + 1, 1:w + 1, :] = x_ref[0].astype(_F32)

    # ---- halo scratch 2: zero the border, interior will be written by conv1
    xpad2_ref[0:1] = jnp.zeros((1, w + 2, cmid), _F32)
    xpad2_ref[h + 1:h + 2] = jnp.zeros((1, w + 2, cmid), _F32)
    xpad2_ref[1:h + 1, 0:1, :] = jnp.zeros((h, 1, cmid), _F32)
    xpad2_ref[1:h + 1, w + 1:w + 2, :] = jnp.zeros((h, 1, cmid), _F32)

    b1 = b1_ref[...]
    b2 = b2_ref[...]
    pcol = pcol_ref[...]

    def conv_strip(xpad, w_ref, c_in, m0, strip):
        acc = None
        for ky in range(3):
            taps = [xpad[m0 + ky:m0 + ky + strip, kx:kx + w, :].reshape(strip * w, c_in)
                    for kx in range(3)]
            patch = jnp.concatenate(taps, axis=-1).astype(_BF16)       # (strip*w, 3*c_in)
            d = jnp.dot(patch, w_ref[ky], preferred_element_type=_F32)
            acc = d if acc is None else acc + d
        return acc

    # ---- conv1 + LeakyReLU, written straight into the interior of xpad2 (never hits HBM)
    for m0 in range(0, h, strip1):
        y = conv_strip(xpad1_ref, w1_ref, cin, m0, strip1) + b1
        y = jnp.maximum(y, LRELU_SLOPE * y)
        xpad2_ref[1 + m0:1 + m0 + strip1, 1:w + 1, :] = y.reshape(strip1, w, cmid)

    # ---- conv2 + LeakyReLU + 2x2 avg pool (row-pair VPU add + small column matmul)
    wh = w // 2
    for m0 in range(0, h, strip2):
        y = conv_strip(xpad2_ref, w2_ref, cmid, m0, strip2) + b2
        y = jnp.maximum(y, LRELU_SLOPE * y)                            # (strip2*w, cmid)
        for i in range(strip2 // 2):
            rowpair = y[(2 * i) * w:(2 * i + 1) * w, :] + y[(2 * i + 1) * w:(2 * i + 2) * w, :]
            pooled = jnp.dot(pcol, rowpair, preferred_element_type=_F32)   # (w/2, cmid)
            r = (m0 // 2 + i) * wh
            opool_ref[r:r + wh, :] = pooled

    # ---- optional fade-in: torch.lerp(pooled, half, 1 - alpha), then one lane-dense store
    out = opool_ref[...]
    if lerp:
        t = 1.0 - alpha_ref[0]
        out = out + t * (half_ref[0] - out)
    o_ref[0] = out.astype(o_ref.dtype)


def stage(x, p, *, half=None, alpha=None, out_dtype=_BF16):
    """x: (N,H,W,Cin) -> flat (N, (H/2)*(W/2), Cmid) after conv,lrelu,conv,lrelu,0.5x[,lerp]."""
    n, h, w, cin = x.shape
    cmid = p['w1'].shape[-1]
    assert p['w1'].shape[1] == 3 * cin and p['w2'].shape[1] == 3 * cmid
    assert h % 2 == 0 and w % 2 == 0 and w % 8 == 0        # strip / pooling alignment
    p_out = (h // 2) * (w // 2)
    lerp = half is not None

    strip1 = _pick_strip(h, w, cmid)
    strip2 = _pick_strip(h, w, cmid, even=True)
    pcol = _col_pool_matrix(w)

    kernel = functools.partial(_stage_kernel, h=h, w=w, cin=cin, cmid=cmid,
                               strip1=strip1, strip2=strip2, lerp=lerp)

    in_specs = [pl.BlockSpec((1, h, w, cin), lambda i: (i, 0, 0, 0)),
                pl.BlockSpec((3, 3 * cin, cmid), lambda i: (0, 0, 0)),
                pl.BlockSpec((1, cmid), lambda i: (0, 0)),
                pl.BlockSpec((3, 3 * cmid, cmid), lambda i: (0, 0, 0)),
                pl.BlockSpec((1, cmid), lambda i: (0, 0)),
                pl.BlockSpec((w // 2, w), lambda i: (0, 0))]
    args = [x, p['w1'], p['b1'], p['w2'], p['b2'], pcol]
    est = (_nbytes((1, h, w, cin), x.dtype) + _nbytes((3, 3 * cin, cmid), _BF16)
           + _nbytes((3, 3 * cmid, cmid), _BF16) + _nbytes((w // 2, w), _F32))
    if lerp:
        in_specs.append(pl.BlockSpec((1, p_out, cmid), lambda i: (i, 0, 0)))
        in_specs.append(pl.BlockSpec(memory_space=pltpu.MemorySpace.SMEM))
        args += [half, jnp.asarray([alpha], _F32)]
        est += _nbytes((1, p_out, cmid), _F32)
    est += (_nbytes((1, p_out, cmid), out_dtype)
            + _nbytes((h + 2, w + 2, cin), _F32) + _nbytes((h + 2, w + 2, cmid), _F32)
            + _nbytes((p_out, cmid), _F32))

    scratch = [pltpu.VMEM((h + 2, w + 2, cin), _F32),
               pltpu.VMEM((h + 2, w + 2, cmid), _F32),
               pltpu.VMEM((p_out, cmid), _F32)]

    return pl.pallas_call(
        kernel,
        out_shape=jax.ShapeDtypeStruct((n, p_out, cmid), out_dtype),
        grid=(n,),
        in_specs=in_specs,
        out_specs=pl.BlockSpec((1, p_out, cmid), lambda i: (i, 0, 0)),
        scratch_shapes=scratch,
        compiler_params=_cparams(est),
    )(*args)


# ----------------------------------------------------------------------------- RGB converter
def _matmul_bias_lrelu_kernel(p_ref, w_ref, b_ref, o_ref):
    y = jnp.dot(p_ref[0], w_ref[...], preferred_element_type=_F32)
    y = y + b_ref[...]
    o_ref[0] = jnp.maximum(y, LRELU_SLOPE * y).astype(o_ref.dtype)


def rgb_conv(x, w32, bias, *, out_dtype=_BF16):
    """CConv2d(3 -> cout, 3, 1, 1) + LeakyReLU.  The 3-channel input is im2col'ed on the host
    (tiny), cast to bf16 and K-padded to 32, so the kernel is one long-K matmul per image."""
    n, h, wdim, cin = x.shape
    cout = w32.shape[-1]
    kdim = w32.shape[0]                                            # 32 (= 27 zero-padded)
    xp = jnp.pad(x, ((0, 0), (1, 1), (1, 1), (0, 0)))
    cols = [xp[:, ky:ky + h, kx:kx + wdim, :] for ky in range(3) for kx in range(3)]
    patches = jnp.concatenate(cols, axis=-1).reshape(n, h * wdim, 9 * cin)
    patches = jnp.pad(patches, ((0, 0), (0, 0), (0, kdim - 9 * cin))).astype(_BF16)
    est = (_nbytes((1, h * wdim, kdim), _BF16) + _nbytes(w32.shape, _BF16)
           + _nbytes((1, h * wdim, cout), out_dtype))
    return pl.pallas_call(
        _matmul_bias_lrelu_kernel,
        out_shape=jax.ShapeDtypeStruct((n, h * wdim, cout), out_dtype),
        grid=(n,),
        in_specs=[pl.BlockSpec((1, h * wdim, kdim), lambda i: (i, 0, 0)),
                  pl.BlockSpec((kdim, cout), lambda i: (0, 0)),
                  pl.BlockSpec((1, cout), lambda i: (0, 0))],
        out_specs=pl.BlockSpec((1, h * wdim, cout), lambda i: (i, 0, 0)),
        compiler_params=_cparams(est),
    )(patches, w32, bias)


# ----------------------------------------------------------------------------- fused output head
def _tail_kernel(x_ref, wc_ref, bc_ref, w1_ref, b1_ref, w2_ref, b2_ref, o_ref, *, cin, cmid):
    # pad-0 3x3 conv on a 4x4 input -> 2x2 = 4 positions, no LeakyReLU (matches the module)
    acc = None
    for ky in range(3):
        for kx in range(3):
            patch = x_ref[0, ky:ky + 2, kx:kx + 2, :].reshape(4, cin).astype(_BF16)
            d = jnp.dot(patch, wc_ref[ky, kx], preferred_element_type=_F32)
            acc = d if acc is None else acc + d
    y = acc + bc_ref[...]                                    # (4, cmid), rows = NCHW spatial s

    # CLinear(cmid*4 -> cmid): the NCHW flatten (in = c*4 + s) is folded into w1 at init as
    # w1[s, c, j] = W1[j, c*4+s] * scale, so we contract over (s, c) with 4 small dots.
    h1 = None
    for s in range(4):
        d = jnp.dot(y[s:s + 1, :].astype(_BF16), w1_ref[s], preferred_element_type=_F32)
        h1 = d if h1 is None else h1 + d
    h1 = h1 + b1_ref[...]
    h1 = jnp.maximum(h1, LRELU_SLOPE * h1)                   # (1, cmid)

    # CLinear(cmid -> 1), weight zero-padded to 128 output lanes for a lane-dense store
    out = jnp.dot(h1.astype(_BF16), w2_ref[...], preferred_element_type=_F32)
    o_ref[0] = out + b2_ref[...]


def output_head(x, p):
    """Fused tail: pad-0 conv -> NCHW flatten -> CLinear+LeakyReLU -> CLinear.  x: (N,4,4,C) f32."""
    n, h, wdim, cin = x.shape
    assert h == 4 and wdim == 4
    cmid = p['conv_w'].shape[-1]
    est = (_nbytes((1, h, wdim, cin), _F32) + _nbytes(p['conv_w'].shape, _BF16)
           + _nbytes(p['l1_w'].shape, _BF16) + _nbytes(p['l2_w'].shape, _BF16)
           + _nbytes((1, 1, 128), _F32))
    out = pl.pallas_call(
        functools.partial(_tail_kernel, cin=cin, cmid=cmid),
        out_shape=jax.ShapeDtypeStruct((n, 1, 128), _F32),
        grid=(n,),
        in_specs=[pl.BlockSpec((1, h, wdim, cin), lambda i: (i, 0, 0, 0)),
                  pl.BlockSpec((3, 3, cin, cmid), lambda i: (0, 0, 0, 0)),
                  pl.BlockSpec((1, cmid), lambda i: (0, 0)),
                  pl.BlockSpec((4, cmid, cmid), lambda i: (0, 0, 0)),
                  pl.BlockSpec((1, cmid), lambda i: (0, 0)),
                  pl.BlockSpec((cmid, 128), lambda i: (0, 0)),
                  pl.BlockSpec((1, 128), lambda i: (0, 0))],
        out_specs=pl.BlockSpec((1, 1, 128), lambda i: (i, 0, 0)),
        compiler_params=_cparams(est),
    )(x, p['conv_w'], p['conv_b'], p['l1_w'], p['l1_b'], p['l2_w'], p['l2_b'])
    return out[:, 0, :1]


# ----------------------------------------------------------------------------- parameters
def init_discriminator(key, image_resolution, image_channels=3, max_channels=384):
    res_log2 = int(log2(image_resolution))
    channels = [min(64 * 2 ** i, max_channels) for i in range(res_log2)]
    keys = iter(jax.random.split(key, 64))

    def raw_conv_w(k, cin, cout):
        # PyTorch CConv2d: weight ~ N(0,1), bias = 0, runtime scale = sqrt(2/(cin*9)).
        # Fold the scale into the weight (exact: the conv is linear).
        scale = (2.0 / (cin * 9)) ** 0.5
        w = jax.random.normal(k, (cout, cin, 3, 3), _F32)             # torch (out,in,kh,kw)
        return jnp.transpose(w, (2, 3, 1, 0)) * scale                 # -> (kh,kw,cin,cout)

    params = {'image_resolution_log2': res_log2, 'rgb': [], 'pre': []}
    kdim = max(32, -(-9 * image_channels // 8) * 8)                   # im2col K padded (27 -> 32)
    last = channels[0]
    for ch in channels[:-2]:
        rw = raw_conv_w(next(keys), image_channels, last).reshape(9 * image_channels, last)
        rw = jnp.pad(rw, ((0, kdim - 9 * image_channels), (0, 0)))
        params['rgb'].append({'w': rw.astype(_BF16), 'b': jnp.zeros((1, last), _F32)})
        w1 = raw_conv_w(next(keys), last, ch).reshape(3, 3 * last, ch)   # kx folded into K
        w2 = raw_conv_w(next(keys), ch, ch).reshape(3, 3 * ch, ch)
        params['pre'].append({'w1': w1.astype(_BF16), 'b1': jnp.zeros((1, ch), _F32),
                              'w2': w2.astype(_BF16), 'b2': jnp.zeros((1, ch), _F32)})
        last = ch

    cw = raw_conv_w(next(keys), last, last).astype(_BF16)                # tail conv (3,3,cin,cout)
    s1 = (2.0 / (last * 4)) ** 0.5
    l1 = jax.random.normal(next(keys), (last, last * 4), _F32)           # torch (out, in)
    # NCHW flatten order is in = c*4 + s; repack as (s, c, out) so the kernel contracts (s, c).
    l1 = (jnp.transpose(l1.reshape(last, last, 4), (2, 1, 0)) * s1).astype(_BF16)
    s2 = (2.0 / last) ** 0.5
    l2 = jax.random.normal(next(keys), (1, last), _F32).T * s2           # -> (in, 1)
    l2 = jnp.pad(l2, ((0, 0), (0, 127))).astype(_BF16)                   # lane-dense (in, 128)
    params['out'] = {'conv_w': cw, 'conv_b': jnp.zeros((1, last), _F32),
                     'l1_w': l1, 'l1_b': jnp.zeros((1, last), _F32),
                     'l2_w': l2, 'l2_b': jnp.zeros((1, 128), _F32)}
    return params


# ----------------------------------------------------------------------------- forward
def discriminator_forward(params, x_nchw, resolution, alpha):
    x = jnp.transpose(x_nchw, (0, 2, 3, 1)).astype(_F32)                 # NCHW -> NHWC
    n = x.shape[0]
    res_log2 = int(log2(resolution))
    start = params['image_resolution_log2'] - res_log2
    res = resolution

    # skip branch: exact 2x2 average (= bilinear 0.5x) of the raw image, then RGB conversion
    half_img = _avgpool2x2_host(x)
    r = params['rgb'][start + 1]
    half = rgb_conv(half_img, r['w'], r['b'], out_dtype=_F32)            # flat (N,(res/2)^2,C0)

    # main branch
    r = params['rgb'][start]
    h = rgb_conv(x, r['w'], r['b'], out_dtype=_BF16)                     # flat (N, res^2, C0)

    stages = params['pre'][start:]
    for si, p in enumerate(stages):
        h = h.reshape(n, res, res, -1)
        is_last = (si == len(stages) - 1)
        h = stage(h, p,
                  half=half if si == 0 else None,                        # fade-in lerp, stage 0
                  alpha=alpha if si == 0 else None,
                  out_dtype=_F32 if is_last else _BF16)                  # tail wants f32
        res //= 2

    return output_head(h.reshape(n, res, res, -1), params['out'])


# ----------------------------------------------------------------------------- demo
if __name__ == "__main__":
    key = jax.random.PRNGKey(0)
    pkey, xkey = jax.random.split(key)

    image_resolution = 16        # res_log2 = 4 -> stage channels [64, 128]
    params = init_discriminator(pkey, image_resolution, image_channels=3, max_channels=384)

    batch = 2
    x = jax.random.normal(xkey, (batch, 3, image_resolution, image_resolution), _F32)
    out = discriminator_forward(params, x, resolution=16, alpha=0.7)     # expected (2, 1)
    out = jax.block_until_ready(out)
    assert out.shape == (batch, 1) and out.dtype == _F32
    print("KERNEL_OK")
</pallas_src>

<mosaic_0001>
module attributes {stable_mosaic.version = 11 : i64} {
  func.func @_matmul_bias_lrelu_kernel(%arg0: i32, %arg1: memref<1x64x32xbf16, #tpu.memory_space<vmem>>, %arg2: memref<32x64xbf16, #tpu.memory_space<vmem>>, %arg3: memref<1x64xf32, #tpu.memory_space<vmem>>, %arg4: memref<1x64x64xf32, #tpu.memory_space<vmem>>) attributes {dimension_semantics = [#tpu.dimension_semantics<parallel>], iteration_bounds = array<i64: 2>, scalar_prefetch = 0 : i64, scratch_operands = 0 : i64, tpu.core_type = #tpu.core_type<tc>, window_params = [{transform_indices = @transform_0, window_bounds = array<i64: 1, 64, 32>}, {pipeline_mode = #tpu.pipeline_mode<synchronous>, transform_indices = @transform_1, window_bounds = array<i64: 32, 64>}, {pipeline_mode = #tpu.pipeline_mode<synchronous>, transform_indices = @transform_2, window_bounds = array<i64: 1, 64>}, {transform_indices = @transform_3, window_bounds = array<i64: 1, 64, 64>}]} {
    %c0 = arith.constant 0 : index
    %c0_0 = arith.constant 0 : index
    %c0_1 = arith.constant 0 : index
    %0 = vector.load %arg1[%c0, %c0_0, %c0_1] : memref<1x64x32xbf16, #tpu.memory_space<vmem>>, vector<1x64x32xbf16>
    %1 = vector.shape_cast %0 : vector<1x64x32xbf16> to vector<64x32xbf16>
    %c0_2 = arith.constant 0 : index
    %c0_3 = arith.constant 0 : index
    %2 = vector.load %arg2[%c0_2, %c0_3] : memref<32x64xbf16, #tpu.memory_space<vmem>>, vector<32x64xbf16>
    %cst = arith.constant dense<0.000000e+00> : vector<64x64xf32>
    %3 = tpu.matmul %1, %2, %cst {dimension_numbers = #tpu.dot_dimension_numbers<[1], [0], [0], [1], [0, 0, 1, 1], [], []>} : vector<64x32xbf16>, vector<32x64xbf16>, vector<64x64xf32> -> vector<64x64xf32>
    %c0_4 = arith.constant 0 : index
    %c0_5 = arith.constant 0 : index
    %4 = vector.load %arg3[%c0_4, %c0_5] : memref<1x64xf32, #tpu.memory_space<vmem>>, vector<1x64xf32>
    %5 = vector.broadcast %4 : vector<1x64xf32> to vector<64x64xf32>
    %6 = arith.addf %3, %5 : vector<64x64xf32>
    %cst_6 = arith.constant 2.000000e-01 : f32
    %7 = vector.broadcast %cst_6 : f32 to vector<64x64xf32>
    %8 = arith.mulf %7, %6 : vector<64x64xf32>
    %9 = arith.maximumf %6, %8 : vector<64x64xf32>
    %c0_7 = arith.constant 0 : index
    %c0_8 = arith.constant 0 : index
    %c0_9 = arith.constant 0 : index
    %10 = vector.load %arg4[%c0_7, %c0_8, %c0_9] : memref<1x64x64xf32, #tpu.memory_space<vmem>>, vector<1x64x64xf32>
    %11 = vector.shape_cast %10 : vector<1x64x64xf32> to vector<64x64xf32>
    %12 = vector.shape_cast %9 : vector<64x64xf32> to vector<1x64x64xf32>
    tpu.vector_store %arg4[%c0_7, %c0_8, %c0_9], %12 {strides = array<i32>} : memref<1x64x64xf32, #tpu.memory_space<vmem>>, vector<1x64x64xf32>,
    return
  }
  func.func @transform_0(%arg0: i32) -> (i32, i32, i32) {
    %c0_i32 = arith.constant 0 : i32
    %c0_i32_0 = arith.constant 0 : i32
    %c0_i32_1 = arith.constant 0 : i32
    return %arg0, %c0_i32, %c0_i32_0 : i32, i32, i32
  }
  func.func @transform_1(%arg0: i32) -> (i32, i32) {
    %c0_i32 = arith.constant 0 : i32
    %c0_i32_0 = arith.constant 0 : i32
    %c0_i32_1 = arith.constant 0 : i32
    return %c0_i32, %c0_i32_0 : i32, i32
  }
  func.func @transform_2(%arg0: i32) -> (i32, i32) {
    %c0_i32 = arith.constant 0 : i32
    %c0_i32_0 = arith.constant 0 : i32
    %c0_i32_1 = arith.constant 0 : i32
    return %c0_i32, %c0_i32_0 : i32, i32
  }
  func.func @transform_3(%arg0: i32) -> (i32, i32, i32) {
    %c0_i32 = arith.constant 0 : i32
    %c0_i32_0 = arith.constant 0 : i32
    %c0_i32_1 = arith.constant 0 : i32
    return %arg0, %c0_i32, %c0_i32_0 : i32, i32, i32
  }
}

</mosaic_0001>

<bundles_post_ra>
// kernel: tpu_custom_call.1
= control target key start
LH: loop header
LB: loop body
LE: loop exit
PB: predicated region body
PF: predicated region fallthrough
CT: control target
= control target key end

     0   :  { %8 = vsyncpa [#allocation3], 0  ;;  %s702_s0 = inlined_call_operand.vmem [shape: bf16[2,64,32], index: 0, kind: input, shape index: {}]   ;;  %s703_s1 = inlined_call_operand.vmem [shape: bf16[32,64], index: 1, kind: input, shape index: {}]   ;;  %s704_s2 = inlined_call_operand.vmem [shape: f32[1,64], index: 2, kind: input, shape index: {}]   ;;  %s705_s3 = inlined_call_operand.hbm [shape: f32[2,64,64], index: 3, kind: output, shape index: {}]  }
   0x1   :  { %10 = vsyncpa [#allocation3 + $0x1], 0  ;;  %s579_s12 = smov 0   ;;  %s581_s13 = smov 0  }
   0x2   :  { %s583_s14 = smov 0   ;;  %s585_s15 = smov 0  }
   0x3 LB: > { %s600_s16 = sadd.s32 4294967295, %s554_s15   ;;  %s400_s17 = sadd.s32 4294967294, %s554_s15   ;;  %s554_s15 = sphi %s585_s15, %s711_s15   ;;  %s550_s14 = sphi %s583_s14, %s710_s14   ;;  %s546_s13 = sphi %s581_s13, %s709_s13   ;;  %s542_s12 = sphi %s579_s12, %s708_s12  }
   0x4   : > { %s604_s18 = sadd.s32 1, %s554_s15   ;;  %s91_s19 = sadd.s32 1, %s550_s14 }
   0x5   : > { %s88_s20 = ssub.s32 %s554_s15, %s604_s18  ;;  %p101_p0 = scmp.ne.s32.totalorder %s550_s14, %s546_s13 }
   0x6   : > { %p89_p1 = scmp.eq.s32.totalorder %s88_s20, 0  ;;  %p102_p2 = scmp.eq.s32.totalorder %s600_s16, 1 }
   0x7   : > { %p107_p3 = scmp.ne.s32.totalorder %s546_s13, %s542_s12  ;;  %p108_p4 = scmp.eq.s32.totalorder %s400_s17, 1 }
   0x8   : > { %s615_s21 = scalar_select %p89_p1, %s550_s14, %s91_s19  }
   0x9   : > { %p617_p5 = por %p102_p2, %p101_p0  ;;  %p621_p6 = por %p108_p4, %p107_p3 }
   0xa   : > { %p403_p7 = scmp.ge.s32.totalorder %s554_s15, 1  ;;  %p140_p8 = scmp.lt.s32.totalorder %s554_s15, 3 }
   0xc   : > { %p141_p9 = pnand %p403_p7, %p140_p8 }
   0xd   : > { %p164_p10 = scmp.lt.s32.totalorder (!%p141_p9), %s600_s16, 1  ;;  %s161_s6 = sand.u32 (!%p141_p9), 1, %s546_s13  }
   0xe   : > { %144 = sbr.rel (%p141_p9) target bundleno = 247 (0xf7), region = 32  ;;  %s404_s9 = sshll.u32 (!%p141_p9), %s161_s6, 6 }
   0xf   : > { %s163_s10 = scalar_lea.vmem (!%p141_p9), [#allocation2], %s404_s9  ;;  %s424_s11 = sshll.u32 (!%p141_p9), %s600_s16, 10 }
  0x10   : > { %s338_s17 = sshll.u32 (!%p141_p9), %s163_s10, 4  ;;  %s653_s24 = scalar_lea.hbm (!%p141_p9), %s705_s3, %s424_s11  ;;  %s655_s17 = int_to_ptr.vmem [resolvable:$true] %s338_s17 }
  0x11   : > { %s494_s25 = scalar_lea.vmem (!%p141_p9), %s655_s17, 1024  ;;  %s556_s26 = smov (!%p141_p9), [#allocation2]  }
  0x12   : > { %p495_p11 = scmp.ne.s32.totalorder (!%p141_p9), %s655_s17, %s494_s25  ;;  %s498_s27 = sshll.u32 (!%p141_p9), %s556_s26, 4  ;;  %s499_s27 = int_to_ptr.vmem [resolvable:$false] %s498_s27 }
  0x13   : > { %v488_v0 = vld [vmem:[%s703_s1 + $0x8] sm:$0xff]   ;;  %v489_v1 = vld [vmem:[%s703_s1] sm:$0xff]   ;;  %s165_s28 = scalar_select %p164_p10, %s600_s16, 1  ;;  %vm221_vm0 = vcmask 261120   ;;  %vm315_vm1 = vcmask 523264  }
  0x14   : > { %431 = vmatprep.subr.bf16.mxu0 %v488_v0  ;;  %443 = vmatprep.subr.bf16.mxu1 %v488_v0  ;;  %v407_v6 = vld [vmem:[%s704_s2] ss:$0 sm:$0xff]  ;;  %s662_s16 = scalar_lea.sflag [#allocation3], %s161_s6  ;;  %p496_p12 = pnand %p495_p11, %p617_p5 }
  0x15   : > { %432 = vmatpush3.bf16.msra.mxu0 %v488_v0  ;;  %445 = vmatpush3.bf16.msra.mxu1 %v488_v0  ;;  %s423_s29 = sshll.u32 %s165_s28, 5  ;;  %s500_s28 = scalar_lea.vmem %s499_s27, 2048 }
  0x16   : > { %433 = vmatprep.subr.bf16.mxu0 %v489_v1  ;;  %444 = vmatprep.subr.bf16.mxu1 %v489_v1  ;;  %s168_s5 = scalar_lea.vmem %s702_s0, %s423_s29  ;;  %p497_p13 = pneg %p496_p12 }
  0x17   : > { %v490_v2 = vld [vmem:[%s168_s5] sm:$0xff]   ;;  %v491_v3 = vld [vmem:[%s168_s5 + $0x10] sm:$0xff]   ;;  %v492_v4 = vld [vmem:[%s168_s5 + $0x8] sm:$0xff]   ;;  %p501_p0 = scmp.lt.s32.totalorder %s655_s17, %s499_s27  ;;  %p502_p1 = scmp.lt.s32.totalorder %s500_s28, %s494_s25 }
  0x18   : > { %435 = vmatprep.mubr.msk.bf16.mxu0 %vm221_vm0, %v490_v2  ;;  %439 = vmatprep.mubr.msk.bf16.mxu1 %vm221_vm0, %v491_v3  ;;  %v493_v5 = vld [vmem:[%s168_s5 + $0x18] sm:$0xff]  }
  0x19   : > { %434 = vmatpush3.bf16.msra.mxu0 %v489_v1  ;;  %446 = vmatpush3.bf16.msra.mxu1 %v489_v1  ;;  %p503_p2 = por %p502_p1, %p501_p0 }
  0x1b   : > { %p504_p3 = pnand %p503_p2, %p497_p13 }
  0x1c   : > { %436 = vmatmul.mubr.msk.bf16.vlgmr.msra.gmra.mxu0 %vm221_vm0, %v492_v4  ;;  %440 = vmatmul.mubr.msk.bf16.vlgmr.msra.gmra.mxu1 %vm221_vm0, %v493_v5 }
  0xdc   : > { %v437_v7 = vpop.f32.mrf.mxu0  ;;  %v441_v9 = vpop.f32.mrf.mxu1 }
  0xdd   : > { %v277_v8 = vadd.f32 %v437_v7, %v407_v6  ;;  %v293_v10 = vadd.f32 %v441_v9, %v407_v6 }
  0xde   : > { %v268_v11 = vpop.f32.mrf.mxu0  ;;  %v284_v14 = vpop.f32.mrf.mxu1 }
  0xdf   : > { %v301_v12 = vmul.f32 0.2, %v277_v8  ;;  %v269_v13 = vadd.f32 %v407_v6, %v268_v11  ;;  %v305_v15 = vmul.f32 0.2, %v293_v10  ;;  %v285_v16 = vadd.f32 %v407_v6, %v284_v14 }
  0xe0   : > { %v438_v17 = vpop.f32.mrf.mxu0  ;;  %v442_v21 = vpop.f32.mrf.mxu1 }
  0xe1   : > { %v309_v18 = vmax.f32 %v277_v8, %v301_v12  ;;  %v299_v19 = vmul.f32 0.2, %v269_v13  ;;  %v280_v20 = vadd.f32 %v438_v17, %v407_v6  ;;  %v313_v22 = vmax.f32 %v293_v10, %v305_v15 }
  0xe2   : > { %v303_v23 = vmul.f32 0.2, %v285_v16  ;;  %v296_v24 = vadd.f32 %v442_v21, %v407_v6  ;;  %v271_v25 = vpop.f32.mrf.mxu0  ;;  %v287_v29 = vpop.f32.mrf.mxu1 }
  0xe3   : > { %318 = vst.msk [vmem:[%s163_s10 + $0x10] sm:$0xff] %vm315_vm1, %v309_v18  ;;  %v307_v26 = vmax.f32 %v269_v13, %v299_v19  ;;  %v302_v27 = vmul.f32 0.2, %v280_v20  ;;  %v272_v28 = vadd.f32 %v407_v6, %v271_v25  ;;  %322 = vst.msk [vmem:[%s163_s10 + $0x30] sm:$0xff] %vm315_vm1, %v313_v22  ;;  %v288_v32 = vadd.f32 %v407_v6, %v287_v29 }
  0xe4   : > { %v311_v30 = vmax.f32 %v285_v16, %v303_v23  ;;  %v306_v31 = vmul.f32 0.2, %v296_v24 }
  0xe5   : > { %316 = vst.msk [vmem:[%s163_s10] sm:$0xff] %vm315_vm1, %v307_v26  ;;  %v310_v33 = vmax.f32 %v280_v20, %v302_v27  ;;  %v300_v34 = vmul.f32 0.2, %v272_v28  ;;  %v304_v36 = vmul.f32 0.2, %v288_v32 }
  0xe6   : > { %320 = vst.msk [vmem:[%s163_s10 + $0x20] sm:$0xff] %vm315_vm1, %v311_v30  ;;  %v314_v35 = vmax.f32 %v296_v24, %v306_v31 }
  0xe7   : > { %319 = vst.msk [vmem:[%s163_s10 + $0x18] sm:$0xff] %vm315_vm1, %v310_v33  ;;  %v308_v37 = vmax.f32 %v272_v28, %v300_v34  ;;  %v312_v38 = vmax.f32 %v288_v32, %v304_v36 }
  0xe8   : > { %323 = vst.msk [vmem:[%s163_s10 + $0x38] sm:$0xff] %vm315_vm1, %v314_v35 }
  0xe9   : > { %317 = vst.msk [vmem:[%s163_s10 + $0x8] sm:$0xff] %vm315_vm1, %v308_v37  ;;  %321 = vst.msk [vmem:[%s163_s10 + $0x28] sm:$0xff] %vm315_vm1, %v312_v38 }
  0xea   : > { %507 = shalt.err (!%p504_p3)
}
  0xeb   : > { %s508_s29 = scalar_lea.hbm %s653_s24, 1024  ;;  %s512_s5 = scalar_lea.hbm %s705_s3, 2048 }
  0xec   : > { %p509_p4 = scmp.ne.s32.totalorder %s653_s24, %s508_s29  ;;  %p513_p9 = scmp.lt.s32.totalorder %s653_s24, %s705_s3 }
  0xed   : > { %p514_p10 = scmp.lt.s32.totalorder %s512_s5, %s508_s29 }
  0xee   : > { %p510_p7 = pnand %p509_p4, %p617_p5 }
  0xef   : > { %p515_p11 = por %p514_p10, %p513_p9 }
  0xf0   : > { %p511_p8 = pneg %p510_p7 }
  0xf2   : > { %p516_p12 = pnand %p515_p11, %p511_p8 }
  0xf4   : > { %519 = shalt.err (!%p516_p12)
}
  0xf5   : > { %s557_s8 = smov 128   ;;  %s558_s9 = smov 8  }
  0xf6   : > { %447 = dma.vmem_to_hbm [thread:$0]  (%p617_p5), %s655_s17, 1024, %s653_s24, %s662_s16, %s557_s8, %s557_s8, %s558_s9  }
  0xf7 PF: > { %p453_p13 = scmp.ge.s32.totalorder %s554_s15, 2  ;;  %s353_s10 = sand.u32 1, %s542_s12  }
  0xf8   : > { %s354_s11 = scalar_lea.sflag [#allocation3], %s353_s10 }
  0xf9   : > { %p450_p0 = pnand %p453_p13, %p621_p6 }
  0xfb   : > { %p451_p1 = pneg %p450_p0 }
  0xfd   : > { %537 = dma.done.wait (%p451_p1), %s354_s11, 1024  }
  0xfe   : > { %539 = vsyncadd (%p451_p1), %s354_s11, 4294966272  ;;  %p13_p2 = scmp.ge.s32.totalorder %s604_s18, 4   ;;  %s708_s12 = smov %s546_s13 }
  0xff   : > { %s709_s13 = smov %s550_s14  ;;  %s710_s14 = smov %s615_s21 }
 0x100   : > { %s711_s15 = smov %s604_s18  ;;  %15 = sbr.rel (!%p13_p2) target bundleno = 3 (0x3), region = 67 }
 0x105   :  { %359 = vsyncpa [#allocation3], 1 }
 0x106   :  { %361 = vsyncpa [#allocation3 + $0x1], 1 }

</bundles_post_ra>
